<compile_context>
chip_gen: v6e
topology: v6e:2x2x1
jax: 0.10.0
libtpu: 0.0.40
codegen_flags: <defaults>
</compile_context>

<pallas_src>
import jax
import jax.numpy as jnp
from jax.experimental import pallas as pl
from jax.experimental.pallas import tpu as pltpu


# ------------------------------ helpers --------------------------------------
def _round_up(x, m):
    return (x + m - 1) // m * m


# ----------------------------- Pallas kernel ---------------------------------
def _make_double_q_kernel(sd, ad, n1, n2):
    """Kernel closure over static layer dims.

    Refs:
      state_ref : (TB, sd)          compute dtype (f32 or bf16)
      action_ref: (TB, ad)          compute dtype
      w_ref     : (3, Kmax, Nmax)   compute dtype, zero-padded fused weights
      b_ref     : (3, 1, Nmax)      f32, zero-padded fused biases
      out_ref   : (TB, 2)           f32, lane-packed [q1 | q2]
    """

    def kernel(state_ref, action_ref, w_ref, b_ref, out_ref):
        cdt = w_ref.dtype
        s = state_ref[...]
        a = action_ref[...]

        # Layer 1: split-K dot — replaces the host-side concat([state, action]).
        # Ref-level static slices of the weight slab are free (no VMEM copy).
        h = (jnp.dot(s, w_ref[0, :sd, :n1], preferred_element_type=jnp.float32)
             + jnp.dot(a, w_ref[0, sd:sd + ad, :n1],
                       preferred_element_type=jnp.float32)
             + b_ref[0, :, :n1])
        h = jnp.maximum(h, 0.0).astype(cdt)                       # ReLU (VPU)

        # Layer 2: block-diagonal fused hidden layer for both Q nets.
        h = (jnp.dot(h, w_ref[1, :n1, :n2], preferred_element_type=jnp.float32)
             + b_ref[1, :, :n2])
        h = jnp.maximum(h, 0.0).astype(cdt)                       # ReLU (VPU)

        # Layer 3: lane-packed output, q1 in lane 0, q2 in lane 1.
        out_ref[...] = (jnp.dot(h, w_ref[2, :n2, :2],
                                preferred_element_type=jnp.float32)
                        + b_ref[2, :, :2])

    return kernel


# --------------------------- param packing (once) -----------------------------
def pack_double_q_params(params_q1, params_q2, dtype=jnp.float32):
    """Fuse the two Q-nets' params into one weight slab + one bias slab.

    Returns (w_slab (3,Kmax,Nmax) in `dtype`, b_slab (3,1,Nmax) f32,
             dims=(in_dim, h1, h2)).
    Do this once when the params are created / updated, not per forward call.
    Pass dtype=jnp.bfloat16 for the halved-HBM-traffic fast path (accumulation
    stays f32 inside the kernel).
    """
    w1a, b1a, w2a, b2a, w3a, b3a = params_q1
    w1b, b1b, w2b, b2b, w3b, b3b = params_q2
    in_dim, h1 = w1a.shape
    h2 = w2a.shape[1]
    n1, n2, n3 = 2 * h1, 2 * h2, 2

    # Fused layer 1: concat along output features.
    W1 = jnp.concatenate([w1a, w1b], axis=1)                        # (in, n1)
    # Fused layers 2/3: block-diagonal (zero blocks cost nothing on the MXU).
    z12 = jnp.zeros((h1, h2), jnp.float32)
    W2 = jnp.concatenate(
        [jnp.concatenate([w2a, z12], axis=1),
         jnp.concatenate([z12, w2b], axis=1)], axis=0)              # (n1, n2)
    z3 = jnp.zeros((h2, 1), jnp.float32)
    W3 = jnp.concatenate(
        [jnp.concatenate([w3a, z3], axis=1),
         jnp.concatenate([z3, w3b], axis=1)], axis=0)               # (n2, 2)

    B1 = jnp.concatenate([b1a, b1b], axis=1)                        # (1, n1)
    B2 = jnp.concatenate([b2a, b2b], axis=1)                        # (1, n2)
    B3 = jnp.concatenate([b3a, b3b], axis=1)                        # (1, 2)

    kmax = max(in_dim, n1, n2)
    nmax = max(n1, n2, n3)

    def pad_w(w):
        return jnp.pad(w, ((0, kmax - w.shape[0]), (0, nmax - w.shape[1])))

    def pad_b(b):
        return jnp.pad(b, ((0, 0), (0, nmax - b.shape[1])))

    w_slab = jnp.stack([pad_w(W1), pad_w(W2), pad_w(W3)]).astype(dtype)
    b_slab = jnp.stack([pad_b(B1), pad_b(B2),
                        pad_b(B3)]).astype(jnp.float32)             # (3,1,Nmax)
    return w_slab, b_slab, (in_dim, h1, h2)


# ------------------------------ forward wrapper --------------------------------
def double_q_critic_forward(state, action, w_slab, b_slab, dims,
                            *, batch_tile=1024):
    """Fused Double-Q forward. Returns (q1, q2), each (B, 1) f32.

    Compute dtype follows w_slab.dtype; for the bf16 fast path the caller
    should ideally store state/action as bf16 already (casting here adds an
    extra HBM pass).
    """
    in_dim, h1, h2 = dims
    sd = state.shape[1]
    ad = action.shape[1]
    assert sd + ad == in_dim, "state_dim + action_dim must match packed params"
    n1, n2 = 2 * h1, 2 * h2
    B = state.shape[0]

    compute_dtype = w_slab.dtype
    if state.dtype != compute_dtype:
        state = state.astype(compute_dtype)
    if action.dtype != compute_dtype:
        action = action.astype(compute_dtype)

    itemsize = jnp.dtype(compute_dtype).itemsize
    sub = 32 // itemsize          # native sublane multiple: 8 (f32) / 16 (bf16)

    # Batch tiling: large tiles amortize per-step overhead, but keep >=2 grid
    # steps when B allows so the 'parallel' axis can shard across both v7x TCs.
    half = -(-B // 2)
    tb = min(_round_up(max(batch_tile, sub), sub),
             _round_up(max(half, 1), sub))
    b_pad = _round_up(B, tb)
    if b_pad != B:
        state = jnp.pad(state, ((0, b_pad - B), (0, 0)))
        action = jnp.pad(action, ((0, b_pad - B), (0, 0)))
    grid = (b_pad // tb,)

    # Explicit VMEM budget (conservative; lane-padded to 128, double-buffered
    # I/O tiles + resident slabs + f32 intermediates), clamped to [16, 64] MiB
    # so large batch_tile values still compile on v5e's 16 MiB default and
    # never exceed v7x's 64 MiB physical VMEM.
    lane = 128
    wslab_vmem = (3 * _round_up(w_slab.shape[1], 8)
                  * _round_up(w_slab.shape[2], lane) * itemsize)
    bslab_vmem = 3 * 8 * _round_up(b_slab.shape[2], lane) * 4
    tile_vmem = (2 * 2 * tb * lane * itemsize      # state+action, double-buffered
                 + 2 * tb * lane * 4               # output tile, double-buffered
                 + 4 * tb * lane * 4)              # in-kernel f32 intermediates
    need = tile_vmem + 2 * (wslab_vmem + bslab_vmem) + (2 << 20)
    vmem_limit = int(min(max(2 * need, 16 << 20), 64 << 20))

    # Advisory cost estimate so XLA schedules the surrounding graph sensibly.
    flops = 2 * b_pad * (in_dim * n1 + n1 * n2 + n2 * 2)
    bytes_accessed = int(b_pad * (sd + ad) * itemsize + b_pad * 2 * 4
                         + w_slab.size * itemsize + b_slab.size * 4)
    cost = pl.CostEstimate(flops=flops, transcendentals=0,
                           bytes_accessed=bytes_accessed)

    kernel = _make_double_q_kernel(sd, ad, n1, n2)

    out = pl.pallas_call(
        kernel,
        grid=grid,
        in_specs=[
            pl.BlockSpec((tb, sd), lambda i: (i, 0)),            # state tile
            pl.BlockSpec((tb, ad), lambda i: (i, 0)),            # action tile
            pl.BlockSpec(w_slab.shape, lambda i: (0, 0, 0)),     # resident weights
            pl.BlockSpec(b_slab.shape, lambda i: (0, 0, 0)),     # resident biases
        ],
        out_specs=pl.BlockSpec((tb, 2), lambda i: (i, 0)),       # lane-packed q1|q2
        out_shape=jax.ShapeDtypeStruct((b_pad, 2), jnp.float32),
        compiler_params=pltpu.CompilerParams(
            dimension_semantics=("parallel",),
            vmem_limit_bytes=vmem_limit),
        cost_estimate=cost,
    )(state, action, w_slab, b_slab)

    q = out[:B]
    return q[:, 0:1], q[:, 1:2]


# -------------------------- deterministic params ------------------------------
def init_mlp_params(key, layers):
    """PyTorch-style uniform(-1/sqrt(fan_in), 1/sqrt(fan_in)) init.
    Weights are returned as (in, out), i.e. already transposed vs torch."""
    params = []
    for i in range(len(layers) - 1):
        fan_in, fan_out = layers[i], layers[i + 1]
        key, kw, kb = jax.random.split(key, 3)
        bound = 1.0 / jnp.sqrt(jnp.float32(fan_in))
        w = jax.random.uniform(kw, (fan_in, fan_out), jnp.float32, -bound, bound)
        b = jax.random.uniform(kb, (1, fan_out), jnp.float32, -bound, bound)
        params += [w, b]
    return params, key


def mlp_reference(sa, params):
    w1, b1, w2, b2, w3, b3 = params
    h = jnp.maximum(sa @ w1 + b1, 0.0)
    h = jnp.maximum(h @ w2 + b2, 0.0)
    return h @ w3 + b3


# ----------------------------------- main -------------------------------------
if __name__ == "__main__":
    # Small shapes consistent with the module.
    batch = 2
    state_dim = 16
    action_dim = 8
    hid_shape = (32, 32)
    layers = [state_dim + action_dim] + list(hid_shape) + [1]   # [24, 32, 32, 1]

    key = jax.random.PRNGKey(0)
    key, ks, ka = jax.random.split(key, 3)
    state = jax.random.normal(ks, (batch, state_dim), jnp.float32)
    action = jax.random.normal(ka, (batch, action_dim), jnp.float32)

    params_q1, key = init_mlp_params(key, layers)
    params_q2, key = init_mlp_params(key, layers)

    # ---- f32 path: exact match against the unfused reference --------------
    w_slab, b_slab, dims = pack_double_q_params(params_q1, params_q2)
    q1, q2 = double_q_critic_forward(state, action, w_slab, b_slab, dims)
    q1 = jax.block_until_ready(q1)
    q2 = jax.block_until_ready(q2)

    sa = jnp.concatenate([state, action], axis=1)
    q1_ref = mlp_reference(sa, params_q1)
    q2_ref = mlp_reference(sa, params_q2)
    assert q1.shape == (batch, 1) and q2.shape == (batch, 1)
    assert jnp.allclose(q1, q1_ref, atol=1e-5, rtol=1e-5)
    assert jnp.allclose(q2, q2_ref, atol=1e-5, rtol=1e-5)

    # ---- bf16 fast path on a multi-tile batch (exercises the >=2-step
    # 'parallel' grid and the halved-HBM-traffic configuration) -------------
    big = 256
    key, ks2, ka2 = jax.random.split(key, 3)
    state_b = jax.random.normal(ks2, (big, state_dim), jnp.float32)
    action_b = jax.random.normal(ka2, (big, action_dim), jnp.float32)
    w16, b16, dims16 = pack_double_q_params(params_q1, params_q2,
                                            dtype=jnp.bfloat16)
    q1b, q2b = double_q_critic_forward(state_b.astype(jnp.bfloat16),
                                       action_b.astype(jnp.bfloat16),
                                       w16, b16, dims16)
    q1b = jax.block_until_ready(q1b)
    q2b = jax.block_until_ready(q2b)
    sab = jnp.concatenate([state_b, action_b], axis=1)
    q1b_ref = mlp_reference(sab, params_q1)
    q2b_ref = mlp_reference(sab, params_q2)
    assert q1b.shape == (big, 1) and q2b.shape == (big, 1)
    assert jnp.allclose(q1b, q1b_ref, atol=5e-2, rtol=5e-2)
    assert jnp.allclose(q2b, q2b_ref, atol=5e-2, rtol=5e-2)

    print("KERNEL_OK")
</pallas_src>

<mosaic_0001>
module attributes {stable_mosaic.version = 11 : i64} {
  func.func @kernel(%arg0: i32, %arg1: memref<8x16xf32, #tpu.memory_space<vmem>>, %arg2: memref<8x8xf32, #tpu.memory_space<vmem>>, %arg3: memref<3x64x64xf32, #tpu.memory_space<vmem>>, %arg4: memref<3x1x64xf32, #tpu.memory_space<vmem>>, %arg5: memref<8x2xf32, #tpu.memory_space<vmem>>) attributes {dimension_semantics = [#tpu.dimension_semantics<parallel>], iteration_bounds = array<i64: 1>, scalar_prefetch = 0 : i64, scratch_operands = 0 : i64, tpu.core_type = #tpu.core_type<tc>, window_params = [{transform_indices = @transform_0, window_bounds = array<i64: 8, 16>}, {transform_indices = @transform_1, window_bounds = array<i64: 8, 8>}, {pipeline_mode = #tpu.pipeline_mode<synchronous>, transform_indices = @transform_2, window_bounds = array<i64: 3, 64, 64>}, {pipeline_mode = #tpu.pipeline_mode<synchronous>, transform_indices = @transform_3, window_bounds = array<i64: 3, 1, 64>}, {transform_indices = @transform_4, window_bounds = array<i64: 8, 2>}]} {
    %c0 = arith.constant 0 : index
    %c0_0 = arith.constant 0 : index
    %0 = vector.load %arg1[%c0, %c0_0] : memref<8x16xf32, #tpu.memory_space<vmem>>, vector<8x16xf32>
    %c0_1 = arith.constant 0 : index
    %c0_2 = arith.constant 0 : index
    %1 = vector.load %arg2[%c0_1, %c0_2] : memref<8x8xf32, #tpu.memory_space<vmem>>, vector<8x8xf32>
    %c0_3 = arith.constant 0 : index
    %c0_4 = arith.constant 0 : index
    %c0_5 = arith.constant 0 : index
    %2 = vector.load %arg3[%c0_3, %c0_4, %c0_5] : memref<3x64x64xf32, #tpu.memory_space<vmem>>, vector<1x16x64xf32>
    %3 = vector.shape_cast %2 : vector<1x16x64xf32> to vector<16x64xf32>
    %cst = arith.constant dense<0.000000e+00> : vector<8x64xf32>
    %4 = tpu.matmul %0, %3, %cst {dimension_numbers = #tpu.dot_dimension_numbers<[1], [0], [0], [1], [0, 0, 1, 1], [], []>} : vector<8x16xf32>, vector<16x64xf32>, vector<8x64xf32> -> vector<8x64xf32>
    %c0_6 = arith.constant 0 : index
    %c16 = arith.constant 16 : index
    %c0_7 = arith.constant 0 : index
    %5 = vector.load %arg3[%c0_6, %c16, %c0_7] : memref<3x64x64xf32, #tpu.memory_space<vmem>>, vector<1x8x64xf32>
    %6 = vector.shape_cast %5 : vector<1x8x64xf32> to vector<8x64xf32>
    %cst_8 = arith.constant dense<0.000000e+00> : vector<8x64xf32>
    %7 = tpu.matmul %1, %6, %cst_8 {dimension_numbers = #tpu.dot_dimension_numbers<[1], [0], [0], [1], [0, 0, 1, 1], [], []>} : vector<8x8xf32>, vector<8x64xf32>, vector<8x64xf32> -> vector<8x64xf32>
    %8 = arith.addf %4, %7 : vector<8x64xf32>
    %c0_9 = arith.constant 0 : index
    %c0_10 = arith.constant 0 : index
    %c0_11 = arith.constant 0 : index
    %9 = vector.load %arg4[%c0_9, %c0_10, %c0_11] : memref<3x1x64xf32, #tpu.memory_space<vmem>>, vector<1x1x64xf32>
    %10 = vector.shape_cast %9 : vector<1x1x64xf32> to vector<1x64xf32>
    %11 = vector.broadcast %10 : vector<1x64xf32> to vector<8x64xf32>
    %12 = arith.addf %8, %11 : vector<8x64xf32>
    %cst_12 = arith.constant 0.000000e+00 : f32
    %13 = vector.broadcast %cst_12 : f32 to vector<8x64xf32>
    %14 = arith.maximumf %12, %13 : vector<8x64xf32>
    %c1 = arith.constant 1 : index
    %c0_13 = arith.constant 0 : index
    %c0_14 = arith.constant 0 : index
    %15 = vector.load %arg3[%c1, %c0_13, %c0_14] : memref<3x64x64xf32, #tpu.memory_space<vmem>>, vector<1x64x64xf32>
    %16 = vector.shape_cast %15 : vector<1x64x64xf32> to vector<64x64xf32>
    %cst_15 = arith.constant dense<0.000000e+00> : vector<8x64xf32>
    %17 = tpu.matmul %14, %16, %cst_15 {dimension_numbers = #tpu.dot_dimension_numbers<[1], [0], [0], [1], [0, 0, 1, 1], [], []>} : vector<8x64xf32>, vector<64x64xf32>, vector<8x64xf32> -> vector<8x64xf32>
    %c1_16 = arith.constant 1 : index
    %c0_17 = arith.constant 0 : index
    %c0_18 = arith.constant 0 : index
    %18 = vector.load %arg4[%c1_16, %c0_17, %c0_18] : memref<3x1x64xf32, #tpu.memory_space<vmem>>, vector<1x1x64xf32>
    %19 = vector.shape_cast %18 : vector<1x1x64xf32> to vector<1x64xf32>
    %20 = vector.broadcast %19 : vector<1x64xf32> to vector<8x64xf32>
    %21 = arith.addf %17, %20 : vector<8x64xf32>
    %cst_19 = arith.constant 0.000000e+00 : f32
    %22 = vector.broadcast %cst_19 : f32 to vector<8x64xf32>
    %23 = arith.maximumf %21, %22 : vector<8x64xf32>
    %c2 = arith.constant 2 : index
    %c0_20 = arith.constant 0 : index
    %c0_21 = arith.constant 0 : index
    %24 = vector.load %arg3[%c2, %c0_20, %c0_21] : memref<3x64x64xf32, #tpu.memory_space<vmem>>, vector<1x64x2xf32>
    %25 = vector.shape_cast %24 : vector<1x64x2xf32> to vector<64x2xf32>
    %cst_22 = arith.constant dense<0.000000e+00> : vector<8x2xf32>
    %26 = tpu.matmul %23, %25, %cst_22 {dimension_numbers = #tpu.dot_dimension_numbers<[1], [0], [0], [1], [0, 0, 1, 1], [], []>} : vector<8x64xf32>, vector<64x2xf32>, vector<8x2xf32> -> vector<8x2xf32>
    %c2_23 = arith.constant 2 : index
    %c0_24 = arith.constant 0 : index
    %c0_25 = arith.constant 0 : index
    %27 = vector.load %arg4[%c2_23, %c0_24, %c0_25] : memref<3x1x64xf32, #tpu.memory_space<vmem>>, vector<1x1x2xf32>
    %28 = vector.shape_cast %27 : vector<1x1x2xf32> to vector<1x2xf32>
    %29 = vector.broadcast %28 : vector<1x2xf32> to vector<8x2xf32>
    %30 = arith.addf %26, %29 : vector<8x2xf32>
    %c0_26 = arith.constant 0 : index
    %c0_27 = arith.constant 0 : index
    %31 = vector.load %arg5[%c0_26, %c0_27] : memref<8x2xf32, #tpu.memory_space<vmem>>, vector<8x2xf32>
    tpu.vector_store %arg5[%c0_26, %c0_27], %30 {strides = array<i32>} : memref<8x2xf32, #tpu.memory_space<vmem>>, vector<8x2xf32>,
    return
  }
  func.func @transform_0(%arg0: i32) -> (i32, i32) {
    %c0_i32 = arith.constant 0 : i32
    %c0_i32_0 = arith.constant 0 : i32
    return %arg0, %c0_i32 : i32, i32
  }
  func.func @transform_1(%arg0: i32) -> (i32, i32) {
    %c0_i32 = arith.constant 0 : i32
    %c0_i32_0 = arith.constant 0 : i32
    return %arg0, %c0_i32 : i32, i32
  }
  func.func @transform_2(%arg0: i32) -> (i32, i32, i32) {
    %c0_i32 = arith.constant 0 : i32
    %c0_i32_0 = arith.constant 0 : i32
    %c0_i32_1 = arith.constant 0 : i32
    %c0_i32_2 = arith.constant 0 : i32
    return %c0_i32, %c0_i32_0, %c0_i32_1 : i32, i32, i32
  }
  func.func @transform_3(%arg0: i32) -> (i32, i32, i32) {
    %c0_i32 = arith.constant 0 : i32
    %c0_i32_0 = arith.constant 0 : i32
    %c0_i32_1 = arith.constant 0 : i32
    %c0_i32_2 = arith.constant 0 : i32
    return %c0_i32, %c0_i32_0, %c0_i32_1 : i32, i32, i32
  }
  func.func @transform_4(%arg0: i32) -> (i32, i32) {
    %c0_i32 = arith.constant 0 : i32
    %c0_i32_0 = arith.constant 0 : i32
    return %arg0, %c0_i32 : i32, i32
  }
}

</mosaic_0001>

<bundles_post_ra>
// kernel: tpu_custom_call.1
= control target key start
LH: loop header
LB: loop body
LE: loop exit
PB: predicated region body
PF: predicated region fallthrough
CT: control target
= control target key end

     0   :  { %9 = vsyncpa [#allocation3], 0  ;;  %s641_s0 = inlined_call_operand.hbm [shape: f32[8,16], index: 0, kind: input, shape index: {}]   ;;  %s642_s1 = inlined_call_operand.hbm [shape: f32[8,8], index: 1, kind: input, shape index: {}]   ;;  %s643_s2 = inlined_call_operand.hbm [shape: f32[3,64,64], index: 2, kind: input, shape index: {}]   ;;  %s644_s3 = inlined_call_operand.vmem [shape: f32[3,1,64], index: 3, kind: input, shape index: {}]   ;;  %s645_s4 = inlined_call_operand.vmem [shape: f32[8,2], index: 4, kind: output, shape index: {}]  }
   0x1   :  { %10 = vsyncpa [#allocation5], 0  ;;  %s559_s15 = smov [#allocation4]   ;;  %s560_s17 = smov [#allocation2]  }
   0x2   :  { %s27_s16 = sshll.u32 %s559_s15, 4  ;;  %s17_s18 = sshll.u32 %s560_s17, 4  ;;  %s28_s16 = int_to_ptr.vmem [resolvable:$true] %s27_s16  ;;  %s18_s18 = int_to_ptr.vmem [resolvable:$true] %s17_s18 }
   0x3   :  { %s503_s19 = scalar_lea.vmem %s28_s16, 128  ;;  %p508_p1 = scmp.lt.s32.totalorder %s28_s16, %s28_s16 }
   0x4   :  { %p504_p0 = scmp.ne.s32.totalorder %s28_s16, %s503_s19  ;;  %p509_p2 = scmp.lt.s32.totalorder %s503_s19, %s503_s19 }
   0x6   :  { %p510_p3 = por %p509_p2, %p508_p1 }
   0x8   :  { %p511_p4 = pnand %p510_p3, %p504_p0 }
   0xa   :  { %514 = shalt.err (!%p511_p4)
}
   0xb   :  { %30 = dma.hbm_to_vmem [thread:$0]  %s642_s1, 128, %s28_s16, [#allocation5]  }
   0xc   :  { %s523_s22 = scalar_lea.vmem %s18_s18, 128  ;;  %p528_p6 = scmp.lt.s32.totalorder %s18_s18, %s18_s18 }
   0xd   :  { %p524_p5 = scmp.ne.s32.totalorder %s18_s18, %s523_s22  ;;  %p529_p7 = scmp.lt.s32.totalorder %s523_s22, %s523_s22 }
   0xf   :  { %p530_p8 = por %p529_p7, %p528_p6 }
  0x11   :  { %p531_p9 = pnand %p530_p8, %p524_p5 }
  0x13   :  { %534 = shalt.err (!%p531_p9)
}
  0x14   :  { %20 = dma.hbm_to_vmem [thread:$0]  %s641_s0, 128, %s18_s18, [#allocation3]  }
  0x15   :  { %s561_s25 = smov [#allocation6]  }
  0x16   :  { %s36_s26 = sshll.u32 %s561_s25, 4  ;;  %s37_s26 = int_to_ptr.vmem [resolvable:$true] %s36_s26 }
  0x17   :  { %s543_s27 = scalar_lea.vmem %s37_s26, 3072  ;;  %p548_p11 = scmp.lt.s32.totalorder %s37_s26, %s37_s26 }
  0x18   :  { %p544_p10 = scmp.ne.s32.totalorder %s37_s26, %s543_s27  ;;  %p549_p12 = scmp.lt.s32.totalorder %s543_s27, %s543_s27 }
  0x1a   :  { %p550_p13 = por %p549_p12, %p548_p11 }
  0x1c   :  { %p551_p0 = pnand %p550_p13, %p544_p10 }
  0x1e   :  { %554 = shalt.err (!%p551_p0)
}
  0x1f   :  { %s562_s1 = smov 128   ;;  %s563_s28 = smov 8  }
  0x20   :  { %42 = dma.hbm_to_vmem [thread:$0]  %s643_s2, 3072, %s37_s26, [#allocation5], %s562_s1, %s562_s1, %s563_s28  }
  0x21   :  { %555 = dma.done.wait [#allocation3], 128  }
  0x22   :  { %556 = vsyncadd [#allocation3], 4294967168 }
  0x23   :  { %557 = dma.done.wait [#allocation5], 3200  }
  0x24   :  { %558 = vsyncadd [#allocation5], 4294964096  ;;  %v564_v0 = vmov 0.0   ;;  %vm565_vm0 = vmmov 0   ;;  %vm59_vm1 = vcmask 64512   ;;  %v58_v1 = vld [vmem:[#allocation6 + $0x10] sm:$0xff] }
  0x25   :  { %438 = vmatprep.subr.mxu0 %v564_v0  ;;  %443 = vmatprep.subr.mxu1 %v564_v0  ;;  %v57_v2 = vld [vmem:[#allocation6 + $0x8] sm:$0xff]  ;;  %v55_v3 = vld [vmem:[#allocation4] sm:$0xff]  ;;  %v56_v4 = vld [vmem:[#allocation6] sm:$0xff]  ;;  %vm133_vm2 = vcmask 130048   ;;  %vm233_vm3 = vcmask 523264   ;;  %vm398_vm4 = vcmask 15360  }
  0x26   :  { %440 = vmatprep.mubr.msk.f32.mxu0 %vm565_vm0, %v564_v0  ;;  %447 = vmatprep.mubr.msk.f32.mxu1 %vm565_vm0, %v564_v0  ;;  %v54_v5 = vld [vmem:[#allocation2] sm:$0xff]  ;;  %v224_v6 = vld [vmem:[#allocation6 + $0x78] sm:$0xff]  ;;  %v222_v8 = vld [vmem:[#allocation6 + $0x68] sm:$0xff] }
  0x27   :  { %439 = vmatpush3.msra.mxu0 %v58_v1  ;;  %444 = vmatpush3.msra.mxu1 %v57_v2  ;;  %v223_v7 = vld [vmem:[#allocation6 + $0x70] sm:$0xff]  ;;  %v221_v9 = vld [vmem:[#allocation6 + $0x60] sm:$0xff]  ;;  %v220_v10 = vld [vmem:[#allocation6 + $0x58] sm:$0xff] }
  0x28   :  { %441 = vmatmul.mubr.msk.f32.vlgmr.msra.gmra.mxu0 %vm59_vm1, %v55_v3  ;;  %445 = vmatprep.subr.mxu1 %v564_v0  ;;  %v219_v11 = vld [vmem:[#allocation6 + $0x50] sm:$0xff]  ;;  %v218_v12 = vld [vmem:[#allocation6 + $0x48] sm:$0xff]  ;;  %v217_v13 = vld [vmem:[#allocation6 + $0x40] sm:$0xff] }
  0x29   :  { %446 = vmatpush3.msra.mxu1 %v56_v4  ;;  %450 = vmatprep.subr.mxu0 %v564_v0  ;;  %v316_v14 = vld [vmem:[#allocation6 + $0xb8] sm:$0xff]  ;;  %v315_v15 = vld [vmem:[#allocation6 + $0xb0] sm:$0xff]  ;;  %v314_v16 = vld [vmem:[#allocation6 + $0xa8] sm:$0xff] }
  0x2a   :  { %448 = vmatmul.mubr.msk.f32.vlgmr.msra.gmra.mxu1 %vm133_vm2, %v54_v5  ;;  %451 = vmatpush3.msra.mxu0 %v224_v6  ;;  %v313_v17 = vld [vmem:[#allocation6 + $0xa0] sm:$0xff]  ;;  %v312_v18 = vld [vmem:[#allocation6 + $0x98] sm:$0xff]  ;;  %v408_v22 = vld [vmem:[%s644_s3] ss:$0 sm:$0xff] }
  0x2b   :  { %452 = vmatprep.subr.mxu0 %v564_v0  ;;  %466 = vmatprep.mubr.msk.f32.mxu0 %vm565_vm0, %v564_v0  ;;  %v311_v27 = vld [vmem:[#allocation6 + $0x90] sm:$0xff]  ;;  %v310_v28 = vld [vmem:[#allocation6 + $0x88] sm:$0xff]  ;;  %v309_v29 = vld [vmem:[#allocation6 + $0x80] sm:$0xff] }
  0x2c   :  { %453 = vmatpush3.msra.mxu0 %v223_v7  ;;  %469 = vmatprep.subr.mxu1 %v564_v0  ;;  %v410_v30 = vld [vmem:[%s644_s3 + $0x1] ss:$0 sm:$0xff]  ;;  %v413_v35 = vld [vmem:[%s644_s3 + $0x2] ss:$0 sm:$0xff] }
  0x2d   :  { %454 = vmatprep.subr.mxu0 %v564_v0  ;;  %485 = vmatprep.mubr.msk.f32.mxu1 %vm565_vm0, %v564_v0 }
  0x2e   :  { %455 = vmatpush3.msra.mxu0 %v222_v8  ;;  %470 = vmatpush3.msra.mxu1 %v316_v14 }
  0x2f   :  { %456 = vmatprep.subr.mxu0 %v564_v0  ;;  %471 = vmatprep.subr.mxu1 %v564_v0 }
  0x30   :  { %457 = vmatpush3.msra.mxu0 %v221_v9  ;;  %472 = vmatpush3.msra.mxu1 %v315_v15 }
  0x31   :  { %458 = vmatprep.subr.mxu0 %v564_v0  ;;  %473 = vmatprep.subr.mxu1 %v564_v0 }
  0x32   :  { %459 = vmatpush3.msra.mxu0 %v220_v10  ;;  %474 = vmatpush3.msra.mxu1 %v314_v16 }
  0x33   :  { %460 = vmatprep.subr.mxu0 %v564_v0  ;;  %475 = vmatprep.subr.mxu1 %v564_v0 }
  0x34   :  { %461 = vmatpush3.msra.mxu0 %v219_v11  ;;  %476 = vmatpush3.msra.mxu1 %v313_v17 }
  0x35   :  { %462 = vmatprep.subr.mxu0 %v564_v0  ;;  %477 = vmatprep.subr.mxu1 %v564_v0 }
  0x36   :  { %463 = vmatpush3.msra.mxu0 %v218_v12  ;;  %478 = vmatpush3.msra.mxu1 %v312_v18 }
  0x37   :  { %464 = vmatprep.subr.mxu0 %v564_v0  ;;  %479 = vmatprep.subr.mxu1 %v564_v0 }
  0x38   :  { %465 = vmatpush3.msra.mxu0 %v217_v13  ;;  %480 = vmatpush3.msra.mxu1 %v311_v27 }
  0x39   :  { %481 = vmatprep.subr.mxu1 %v564_v0 }
  0x3a   :  { %482 = vmatpush3.msra.mxu1 %v310_v28 }
  0x3b   :  { %483 = vmatprep.subr.mxu1 %v564_v0 }
  0x3c   :  { %484 = vmatpush3.msra.mxu1 %v309_v29 }
  0xe8   :  { %v129_v19 = vpop.f32.mrf.mxu0 }
  0xea   :  { %v442_v20 = vpop.f32.mrf.mxu0  ;;  %v203_v21 = vpop.f32.mrf.mxu1 }
  0xeb   :  { %v204_v23 = vadd.f32 %v203_v21, %v129_v19 }
  0xec   :  { %v449_v24 = vpop.f32.mrf.mxu1 }
  0xed   :  { %v214_v25 = vadd.f32 %v408_v22, %v204_v23 }
  0xef   :  { %v215_v26 = vmax.f32 %v214_v25, 0.0 }
  0xf1   :  { %467 = vmatmul.mubr.msk.f32.vlgmr.msra.gmra.mxu0 %vm233_vm3, %v215_v26 }
 0x1b1   :  { %v303_v31 = vpop.f32.mrf.mxu0 }
 0x1b2   :  { %v304_v32 = vadd.f32 %v410_v30, %v303_v31 }
 0x1b3   :  { %v468_v33 = vpop.f32.mrf.mxu0 }
 0x1b4   :  { %v307_v34 = vmax.f32 %v304_v32, 0.0 }
 0x1b6   :  { %486 = vmatmul.mubr.msk.f32.vlgmr.msra.gmra.mxu1 %vm233_vm3, %v307_v34 }
 0x276   :  { %v394_v36 = vpop.f32.mrf.mxu1 }
 0x277   :  { %v395_v37 = vadd.f32 %v413_v35, %v394_v36 }
 0x278   :  { %v487_v38 = vpop.f32.mrf.mxu1 }
 0x279   :  { %399 = vst.msk [vmem:[%s645_s4] sm:$0xff] %vm398_vm4, %v395_v37 }
 0x27a   :  { %404 = vsyncpa [#allocation3], 1 }
 0x27b   :  { %405 = vsyncpa [#allocation5], 1 }

</bundles_post_ra>
